<compile_context>
chip_gen: v6e
topology: v6e:2x2x1
jax: 0.10.0
libtpu: 0.0.40
codegen_flags: <defaults>
</compile_context>

<pallas_src>
import functools

import jax
import jax.numpy as jnp
from jax import lax
from jax.experimental import pallas as pl
from jax.experimental.pallas import tpu as pltpu

LANE = 128        # pixels per lane row
ROW_ALIGN = 32    # lcm of f32 (8,128) and int8 (32,128) sublane tiling
STRIP = 32        # rows per inner compute strip (bounds live vregs to ~35/64)


def _mono_normal_loss_kernel(rinv_ref, pred_ref, gt_ref, remain_ref,
                             out_ref, acc_ref, *, row_tile):
    """One grid step consumes a (3, row_tile, LANE) tile of pred/gt normals and
    a (row_tile, LANE) int8 remain-mask tile.

    acc_ref: (3, 8, LANE) f32 VMEM scratch, resident across the inner
    ("arbitrary") grid axis:
        acc_ref[0]: per-(sublane, lane) partial sum of masked L1
        acc_ref[1]: per-(sublane, lane) partial sum of masked (1 - cos)
        acc_ref[2]: per-(sublane, lane) mask count
    out_ref: (3, 8, LANE) lane-dense output block for this parallel chunk,
    written once (unmasked, aligned) at the last inner step.
    """
    i = pl.program_id(1)

    @pl.when(i == 0)
    def _():
        acc_ref[...] = jnp.zeros_like(acc_ref)

    # Rotation scalars from SMEM -> locals once per tile (loop-invariant).
    r00 = rinv_ref[0]; r01 = rinv_ref[1]; r02 = rinv_ref[2]
    r10 = rinv_ref[3]; r11 = rinv_ref[4]; r12 = rinv_ref[5]
    r20 = rinv_ref[6]; r21 = rinv_ref[7]; r22 = rinv_ref[8]

    eps2 = jnp.float32(1e-24)
    n_strips = row_tile // STRIP

    def part8(x):  # (STRIP, LANE) -> (8, LANE): aligned vreg adds, no XLU
        return jnp.sum(x.reshape(STRIP // 8, 8, LANE), axis=0)

    def strip_body(s, carry):
        a_l1, a_cos, a_cnt = carry
        row0 = pl.multiple_of(s * STRIP, STRIP)
        rows = pl.ds(row0, STRIP)

        p0 = pred_ref[0, rows, :]          # (STRIP, LANE) world-space pred
        p1 = pred_ref[1, rows, :]
        p2 = pred_ref[2, rows, :]

        # rotate prediction by R^{-1} (world -> camera), unrolled 3x3
        rp0 = r00 * p0 + r01 * p1 + r02 * p2
        rp1 = r10 * p0 + r11 * p1 + r12 * p2
        rp2 = r20 * p0 + r21 * p1 + r22 * p2

        # F.normalize: x / clamp(||x||, 1e-12) == x * rsqrt(max(||x||^2, 1e-24))
        # rsqrt runs on the EUP slot, freeing the VALU.
        inv_p = lax.rsqrt(jnp.maximum(rp0 * rp0 + rp1 * rp1 + rp2 * rp2, eps2))
        np0 = rp0 * inv_p
        np1 = rp1 * inv_p
        np2 = rp2 * inv_p

        g0 = gt_ref[0, rows, :]            # (STRIP, LANE) mono GT normals
        g1 = gt_ref[1, rows, :]
        g2 = gt_ref[2, rows, :]
        inv_g = lax.rsqrt(jnp.maximum(g0 * g0 + g1 * g1 + g2 * g2, eps2))
        ng0 = g0 * inv_g
        ng1 = g1 * inv_g
        ng2 = g2 * inv_g

        # remain mask pre-fused in the wrapper (int8 0/1; padded pixels are 0)
        m = remain_ref[rows, :].astype(jnp.float32)

        l1 = jnp.abs(np0 - ng0) + jnp.abs(np1 - ng1) + jnp.abs(np2 - ng2)
        cos = 1.0 - (np0 * ng0 + np1 * ng1 + np2 * ng2)

        return (a_l1 + part8(l1 * m), a_cos + part8(cos * m), a_cnt + part8(m))

    zero8 = jnp.zeros((8, LANE), jnp.float32)
    s_l1, s_cos, s_cnt = lax.fori_loop(0, n_strips, strip_body,
                                       (zero8, zero8, zero8))

    # One aligned full-vreg RMW per quantity per grid step.
    acc_ref[0] += s_l1
    acc_ref[1] += s_cos
    acc_ref[2] += s_cnt

    @pl.when(i == pl.num_programs(1) - 1)
    def _():
        out_ref[...] = acc_ref[...]


@functools.partial(
    jax.jit,
    static_argnames=("w_l1", "w_cos", "mask_pred_thresh", "max_row_tile"))
def mono_normal_loss(normal_pred_cf, normal_gt_cf, mask_volume, occupancy_mask,
                     human_mask, rot_w2c, *, w_l1=1.0, w_cos=1.0,
                     mask_pred_thresh=0.5, max_row_tile=1024):
    """Pallas implementation of MonoNormalLoss.forward (pixels / crdv path).

    Args:
      normal_pred_cf: (3, H, W) f32 rendered normals, CHANNEL-MAJOR (world).
      normal_gt_cf:   (3, H, W) f32 mono GT normals, CHANNEL-MAJOR (camera).
      mask_volume:    (H, W)    f32 rendered opacity mask.
      occupancy_mask: (H, W)    bool/{0,1} image_occupancy_mask.
      human_mask:     (H, W)    bool/{0,1} image_human_mask.
      rot_w2c:        (3, 3)    f32 inverse camera rotation (world -> camera).
      max_row_tile:   rows of 128 pixels per grid step (multiple of 32).
    Returns dict with 'loss_mono_normal.l1' and 'loss_mono_normal.cos'.
    """
    assert max_row_tile % ROW_ALIGN == 0 and max_row_tile >= ROW_ALIGN
    _, H, W = normal_pred_cf.shape
    n = H * W
    r = pl.cdiv(n, LANE)                                   # rows of 128 pixels
    row_tile = max(ROW_ALIGN,
                   min(int(max_row_tile), pl.cdiv(r, ROW_ALIGN) * ROW_ALIGN))
    num_tiles = pl.cdiv(r, row_tile)
    # 2-way leading "parallel" super-chunk axis (v7x two-TC split; harmless on
    # single-TC v5e/v6e).  Odd tile counts are padded up to even so the second
    # chunk is never dropped.
    num_par = 2 if num_tiles >= 2 else 1
    inner = pl.cdiv(num_tiles, num_par)
    total_tiles = num_par * inner
    r_pad = total_tiles * row_tile
    n_pad = r_pad * LANE
    pad = n_pad - n

    def normals_to_tiles(x_cf):   # (3,H,W) -> (3, r_pad, LANE): no transpose
        flat = x_cf.reshape(3, n).astype(jnp.float32)
        flat = jnp.pad(flat, ((0, 0), (0, pad)))
        return flat.reshape(3, r_pad, LANE)

    pred_t = normals_to_tiles(normal_pred_cf)
    gt_t = normals_to_tiles(normal_gt_cf)

    # Pre-fused remain mask as a single int8 array (fuses into the pad pass).
    remain = ((mask_volume.astype(jnp.float32) > mask_pred_thresh)
              & occupancy_mask.astype(bool)
              & jnp.logical_not(human_mask.astype(bool)))
    remain_t = jnp.pad(remain.reshape(n).astype(jnp.int8),
                       (0, pad)).reshape(r_pad, LANE)      # padded pixels -> 0

    rinv_flat = rot_w2c.reshape(9).astype(jnp.float32)

    kernel = functools.partial(_mono_normal_loss_kernel, row_tile=row_tile)

    acc = pl.pallas_call(
        kernel,
        out_shape=jax.ShapeDtypeStruct((num_par * 3, 8, LANE), jnp.float32),
        grid_spec=pltpu.PrefetchScalarGridSpec(
            num_scalar_prefetch=0,
            grid=(num_par, inner),
            in_specs=[
                pl.BlockSpec(memory_space=pltpu.MemorySpace.SMEM),   # rinv (9,)
                pl.BlockSpec((3, row_tile, LANE),
                             lambda p, i: (0, p * inner + i, 0)),    # pred
                pl.BlockSpec((3, row_tile, LANE),
                             lambda p, i: (0, p * inner + i, 0)),    # gt
                pl.BlockSpec((row_tile, LANE),
                             lambda p, i: (p * inner + i, 0)),       # remain i8
            ],
            out_specs=pl.BlockSpec((3, 8, LANE), lambda p, i: (p, 0, 0)),
            scratch_shapes=[pltpu.VMEM((3, 8, LANE), jnp.float32)],
        ),
        compiler_params=pltpu.CompilerParams(
            dimension_semantics=("parallel", "arbitrary"),
            vmem_limit_bytes=32 * 1024 * 1024),
    )(rinv_flat, pred_t, gt_t, remain_t)

    # Final reduce over parallel partials + 8 sublanes + 128 lanes (tiny glue).
    sums = jnp.sum(acc.reshape(num_par, 3, 8, LANE), axis=(0, 2, 3))
    l1_sum, cos_sum, cnt = sums[0], sums[1], sums[2]
    denom = jnp.maximum(cnt, 1.0)
    return {
        "loss_mono_normal.l1": w_l1 * (l1_sum / denom),
        "loss_mono_normal.cos": w_cos * (cos_sum / denom),
    }


def mono_normal_loss_hwc(normal_pred, normal_gt, mask_volume, occupancy_mask,
                         human_mask, rot_w2c, **kw):
    """Compatibility wrapper for the original pixel-major (H, W, 3) layout.

    Re-introduces a transpose pass over the normals; prefer the channel-major
    entry point when the producer can emit (3, H, W) directly.
    """
    return mono_normal_loss(jnp.moveaxis(normal_pred, -1, 0),
                            jnp.moveaxis(normal_gt, -1, 0),
                            mask_volume, occupancy_mask, human_mask,
                            rot_w2c, **kw)


def _reference_loss(normal_pred_cf, normal_gt_cf, mask_volume, occupancy_mask,
                    human_mask, rot_w2c, *, w_l1=1.0, w_cos=1.0,
                    mask_pred_thresh=0.5):
    """Pure-JAX reference mirroring the PyTorch forward (pixels / crdv path)."""
    pred = jnp.moveaxis(normal_pred_cf, 0, -1)     # (H, W, 3)
    gt = jnp.moveaxis(normal_gt_cf, 0, -1)
    rp = jnp.einsum("ij,hwj->hwi", rot_w2c, pred)

    def normalize(x):
        norm = jnp.sqrt(jnp.sum(x * x, axis=-1, keepdims=True))
        return x / jnp.maximum(norm, 1e-12)

    npd = normalize(rp)
    ngt = normalize(gt)
    remain = ((mask_volume > mask_pred_thresh)
              & occupancy_mask.astype(bool)
              & jnp.logical_not(human_mask.astype(bool))).astype(jnp.float32)
    l1 = jnp.sum(jnp.abs(npd - ngt), axis=-1)
    cos = 1.0 - jnp.sum(npd * ngt, axis=-1)
    denom = jnp.maximum(remain.sum(), 1.0)
    return {
        "loss_mono_normal.l1": w_l1 * jnp.sum(l1 * remain) / denom,
        "loss_mono_normal.cos": w_cos * jnp.sum(cos * remain) / denom,
    }


def _rotation_matrix():
    """Deterministic camera world-rotation; return its inverse (transpose)."""
    ax, ay, az = 0.3, -0.4, 0.7
    cx, sx = jnp.cos(ax), jnp.sin(ax)
    cy, sy = jnp.cos(ay), jnp.sin(ay)
    cz, sz = jnp.cos(az), jnp.sin(az)
    rx = jnp.array([[1, 0, 0], [0, cx, -sx], [0, sx, cx]], jnp.float32)
    ry = jnp.array([[cy, 0, sy], [0, 1, 0], [-sy, 0, cy]], jnp.float32)
    rz = jnp.array([[cz, -sz, 0], [sz, cz, 0], [0, 0, 1]], jnp.float32)
    r_c2w = rz @ ry @ rx
    return r_c2w.T  # inverse rotation (rotate(..., inv=True))


def _run_case(key, H, W, rot_w2c, max_row_tile, via_hwc=False):
    k1, k2, k3, k4, k5 = jax.random.split(key, 5)
    pred_cf = jax.random.normal(k1, (3, H, W), jnp.float32)   # channel-major
    gt_cf = jax.random.normal(k2, (3, H, W), jnp.float32)
    mask_volume = jax.random.uniform(k3, (H, W), jnp.float32)
    occupancy_mask = jax.random.uniform(k4, (H, W)) > 0.2     # bool
    human_mask = jax.random.uniform(k5, (H, W)) > 0.85        # bool

    kwargs = dict(w_l1=1.0, w_cos=1.0, mask_pred_thresh=0.5,
                  max_row_tile=max_row_tile)
    if via_hwc:
        losses = mono_normal_loss_hwc(
            jnp.moveaxis(pred_cf, 0, -1), jnp.moveaxis(gt_cf, 0, -1),
            mask_volume, occupancy_mask, human_mask, rot_w2c, **kwargs)
    else:
        losses = mono_normal_loss(pred_cf, gt_cf, mask_volume, occupancy_mask,
                                  human_mask, rot_w2c, **kwargs)
    losses = jax.block_until_ready(losses)

    ref = _reference_loss(pred_cf, gt_cf, mask_volume, occupancy_mask,
                          human_mask, rot_w2c,
                          w_l1=1.0, w_cos=1.0, mask_pred_thresh=0.5)
    for name in ("loss_mono_normal.l1", "loss_mono_normal.cos"):
        assert jnp.allclose(losses[name], ref[name], rtol=1e-4, atol=1e-5), (
            name, float(losses[name]), float(ref[name]))


if __name__ == "__main__":
    key = jax.random.PRNGKey(0)
    k_a, k_b, k_c, k_d = jax.random.split(key, 4)
    rot_w2c = _rotation_matrix()

    # single tile, num_par=1, heavy zero-padding
    _run_case(k_a, 16, 16, rot_w2c, max_row_tile=1024)
    # same shapes through the (H, W, 3) compatibility wrapper (cached compile)
    _run_case(k_a, 16, 16, rot_w2c, max_row_tile=1024, via_hwc=True)
    # 4 tiles -> 2 parallel chunks x 2 inner accumulation steps, no padding
    _run_case(k_b, 128, 128, rot_w2c, max_row_tile=32)
    # 2 tiles -> 2 parallel chunks, 2-strip inner compute loop
    _run_case(k_c, 128, 128, rot_w2c, max_row_tile=64)
    # odd tile count (3) padded up to even: last tile is all padding
    _run_case(k_d, 96, 128, rot_w2c, max_row_tile=32)

    print("KERNEL_OK")
</pallas_src>

<mosaic_0001>
module attributes {stable_mosaic.version = 11 : i64} {
  func.func @_mono_normal_loss_kernel(%arg0: i32, %arg1: i32, %arg2: memref<9xf32, #tpu.memory_space<smem>>, %arg3: memref<3x32x128xf32, #tpu.memory_space<vmem>>, %arg4: memref<3x32x128xf32, #tpu.memory_space<vmem>>, %arg5: memref<32x128xi8, #tpu.memory_space<vmem>>, %arg6: memref<3x8x128xf32, #tpu.memory_space<vmem>>, %arg7: memref<3x8x128xf32, #tpu.memory_space<vmem>>) attributes {dimension_semantics = [#tpu.dimension_semantics<parallel>, #tpu.dimension_semantics<arbitrary>], iteration_bounds = array<i64: 1, 1>, scalar_prefetch = 0 : i64, scratch_operands = 1 : i64, tpu.core_type = #tpu.core_type<tc>, window_params = [{transform_indices = @transform_0, window_bounds = array<i64: 9>}, {transform_indices = @transform_1, window_bounds = array<i64: 3, 32, 128>}, {transform_indices = @transform_2, window_bounds = array<i64: 3, 32, 128>}, {transform_indices = @transform_3, window_bounds = array<i64: 32, 128>}, {transform_indices = @transform_4, window_bounds = array<i64: 3, 8, 128>}]} {
    %c0_i32 = arith.constant 0 : i32
    %0 = arith.cmpi eq, %arg1, %c0_i32 : i32
    %1 = arith.extui %0 : i1 to i32
    %c0_i32_0 = arith.constant 0 : i32
    %2 = arith.cmpi ne, %1, %c0_i32_0 : i32
    scf.if %2 {
      %cst_40 = arith.constant 0.000000e+00 : f32
      %129 = vector.broadcast %cst_40 : f32 to vector<3x8x128xf32>
      %c0_41 = arith.constant 0 : index
      %c0_42 = arith.constant 0 : index
      %c0_43 = arith.constant 0 : index
      %130 = vector.load %arg7[%c0_41, %c0_42, %c0_43] : memref<3x8x128xf32, #tpu.memory_space<vmem>>, vector<3x8x128xf32>
      tpu.vector_store %arg7[%c0_41, %c0_42, %c0_43], %129 {strides = array<i32>} : memref<3x8x128xf32, #tpu.memory_space<vmem>>, vector<3x8x128xf32>,
    } else {
    }
    %c0 = arith.constant 0 : index
    %3 = memref.load %arg2[%c0] : memref<9xf32, #tpu.memory_space<smem>>
    %c1 = arith.constant 1 : index
    %4 = memref.load %arg2[%c1] : memref<9xf32, #tpu.memory_space<smem>>
    %c2 = arith.constant 2 : index
    %5 = memref.load %arg2[%c2] : memref<9xf32, #tpu.memory_space<smem>>
    %c3 = arith.constant 3 : index
    %6 = memref.load %arg2[%c3] : memref<9xf32, #tpu.memory_space<smem>>
    %c4 = arith.constant 4 : index
    %7 = memref.load %arg2[%c4] : memref<9xf32, #tpu.memory_space<smem>>
    %c5 = arith.constant 5 : index
    %8 = memref.load %arg2[%c5] : memref<9xf32, #tpu.memory_space<smem>>
    %c6 = arith.constant 6 : index
    %9 = memref.load %arg2[%c6] : memref<9xf32, #tpu.memory_space<smem>>
    %c7 = arith.constant 7 : index
    %10 = memref.load %arg2[%c7] : memref<9xf32, #tpu.memory_space<smem>>
    %c8 = arith.constant 8 : index
    %11 = memref.load %arg2[%c8] : memref<9xf32, #tpu.memory_space<smem>>
    %cst = arith.constant 0.000000e+00 : f32
    %12 = vector.broadcast %cst : f32 to vector<8x128xf32>
    %cst_1 = arith.constant 1.000000e-24 : f32
    %c0_i32_2 = arith.constant 0 : i32
    %c32_i32 = arith.constant 32 : i32
    %13 = arith.muli %c0_i32_2, %c32_i32 : i32
    %14 = tpu.assume_multiple %13, 32 : i32
    %c0_3 = arith.constant 0 : index
    %15 = arith.index_cast %14 : i32 to index
    %c0_4 = arith.constant 0 : index
    %16 = vector.load %arg3[%c0_3, %15, %c0_4] : memref<3x32x128xf32, #tpu.memory_space<vmem>>, vector<1x32x128xf32>
    %17 = vector.shape_cast %16 : vector<1x32x128xf32> to vector<32x128xf32>
    %c1_5 = arith.constant 1 : index
    %18 = arith.index_cast %14 : i32 to index
    %c0_6 = arith.constant 0 : index
    %19 = vector.load %arg3[%c1_5, %18, %c0_6] : memref<3x32x128xf32, #tpu.memory_space<vmem>>, vector<1x32x128xf32>
    %20 = vector.shape_cast %19 : vector<1x32x128xf32> to vector<32x128xf32>
    %c2_7 = arith.constant 2 : index
    %21 = arith.index_cast %14 : i32 to index
    %c0_8 = arith.constant 0 : index
    %22 = vector.load %arg3[%c2_7, %21, %c0_8] : memref<3x32x128xf32, #tpu.memory_space<vmem>>, vector<1x32x128xf32>
    %23 = vector.shape_cast %22 : vector<1x32x128xf32> to vector<32x128xf32>
    %24 = vector.broadcast %3 : f32 to vector<32x128xf32>
    %25 = arith.mulf %24, %17 : vector<32x128xf32>
    %26 = vector.broadcast %4 : f32 to vector<32x128xf32>
    %27 = arith.mulf %26, %20 : vector<32x128xf32>
    %28 = arith.addf %25, %27 : vector<32x128xf32>
    %29 = vector.broadcast %5 : f32 to vector<32x128xf32>
    %30 = arith.mulf %29, %23 : vector<32x128xf32>
    %31 = arith.addf %28, %30 : vector<32x128xf32>
    %32 = vector.broadcast %6 : f32 to vector<32x128xf32>
    %33 = arith.mulf %32, %17 : vector<32x128xf32>
    %34 = vector.broadcast %7 : f32 to vector<32x128xf32>
    %35 = arith.mulf %34, %20 : vector<32x128xf32>
    %36 = arith.addf %33, %35 : vector<32x128xf32>
    %37 = vector.broadcast %8 : f32 to vector<32x128xf32>
    %38 = arith.mulf %37, %23 : vector<32x128xf32>
    %39 = arith.addf %36, %38 : vector<32x128xf32>
    %40 = vector.broadcast %9 : f32 to vector<32x128xf32>
    %41 = arith.mulf %40, %17 : vector<32x128xf32>
    %42 = vector.broadcast %10 : f32 to vector<32x128xf32>
    %43 = arith.mulf %42, %20 : vector<32x128xf32>
    %44 = arith.addf %41, %43 : vector<32x128xf32>
    %45 = vector.broadcast %11 : f32 to vector<32x128xf32>
    %46 = arith.mulf %45, %23 : vector<32x128xf32>
    %47 = arith.addf %44, %46 : vector<32x128xf32>
    %48 = arith.mulf %31, %31 : vector<32x128xf32>
    %49 = arith.mulf %39, %39 : vector<32x128xf32>
    %50 = arith.addf %48, %49 : vector<32x128xf32>
    %51 = arith.mulf %47, %47 : vector<32x128xf32>
    %52 = arith.addf %50, %51 : vector<32x128xf32>
    %53 = vector.broadcast %cst_1 : f32 to vector<32x128xf32>
    %54 = arith.maximumf %52, %53 : vector<32x128xf32>
    %55 = math.rsqrt %54 : vector<32x128xf32>
    %56 = arith.mulf %31, %55 : vector<32x128xf32>
    %57 = arith.mulf %39, %55 : vector<32x128xf32>
    %58 = arith.mulf %47, %55 : vector<32x128xf32>
    %c0_9 = arith.constant 0 : index
    %59 = arith.index_cast %14 : i32 to index
    %c0_10 = arith.constant 0 : index
    %60 = vector.load %arg4[%c0_9, %59, %c0_10] : memref<3x32x128xf32, #tpu.memory_space<vmem>>, vector<1x32x128xf32>
    %61 = vector.shape_cast %60 : vector<1x32x128xf32> to vector<32x128xf32>
    %c1_11 = arith.constant 1 : index
    %62 = arith.index_cast %14 : i32 to index
    %c0_12 = arith.constant 0 : index
    %63 = vector.load %arg4[%c1_11, %62, %c0_12] : memref<3x32x128xf32, #tpu.memory_space<vmem>>, vector<1x32x128xf32>
    %64 = vector.shape_cast %63 : vector<1x32x128xf32> to vector<32x128xf32>
    %c2_13 = arith.constant 2 : index
    %65 = arith.index_cast %14 : i32 to index
    %c0_14 = arith.constant 0 : index
    %66 = vector.load %arg4[%c2_13, %65, %c0_14] : memref<3x32x128xf32, #tpu.memory_space<vmem>>, vector<1x32x128xf32>
    %67 = vector.shape_cast %66 : vector<1x32x128xf32> to vector<32x128xf32>
    %68 = arith.mulf %61, %61 : vector<32x128xf32>
    %69 = arith.mulf %64, %64 : vector<32x128xf32>
    %70 = arith.addf %68, %69 : vector<32x128xf32>
    %71 = arith.mulf %67, %67 : vector<32x128xf32>
    %72 = arith.addf %70, %71 : vector<32x128xf32>
    %73 = vector.broadcast %cst_1 : f32 to vector<32x128xf32>
    %74 = arith.maximumf %72, %73 : vector<32x128xf32>
    %75 = math.rsqrt %74 : vector<32x128xf32>
    %76 = arith.mulf %61, %75 : vector<32x128xf32>
    %77 = arith.mulf %64, %75 : vector<32x128xf32>
    %78 = arith.mulf %67, %75 : vector<32x128xf32>
    %79 = arith.index_cast %14 : i32 to index
    %c0_15 = arith.constant 0 : index
    %80 = vector.load %arg5[%79, %c0_15] : memref<32x128xi8, #tpu.memory_space<vmem>>, vector<32x128xi8>
    %81 = arith.sitofp %80 : vector<32x128xi8> to vector<32x128xf32>
    %82 = arith.subf %56, %76 : vector<32x128xf32>
    %83 = math.absf %82 : vector<32x128xf32>
    %84 = arith.subf %57, %77 : vector<32x128xf32>
    %85 = math.absf %84 : vector<32x128xf32>
    %86 = arith.addf %83, %85 : vector<32x128xf32>
    %87 = arith.subf %58, %78 : vector<32x128xf32>
    %88 = math.absf %87 : vector<32x128xf32>
    %89 = arith.addf %86, %88 : vector<32x128xf32>
    %90 = arith.mulf %56, %76 : vector<32x128xf32>
    %91 = arith.mulf %57, %77 : vector<32x128xf32>
    %92 = arith.addf %90, %91 : vector<32x128xf32>
    %93 = arith.mulf %58, %78 : vector<32x128xf32>
    %94 = arith.addf %92, %93 : vector<32x128xf32>
    %cst_16 = arith.constant 1.000000e+00 : f32
    %95 = vector.broadcast %cst_16 : f32 to vector<32x128xf32>
    %96 = arith.subf %95, %94 : vector<32x128xf32>
    %97 = arith.mulf %89, %81 : vector<32x128xf32>
    %98 = vector.shape_cast %97 : vector<32x128xf32> to vector<4x8x128xf32>
    %cst_17 = arith.constant dense<0.000000e+00> : vector<8x128xf32>
    %99 = vector.multi_reduction <add>, %98, %cst_17 [0] : vector<4x8x128xf32> to vector<8x128xf32>
    %100 = arith.addf %12, %99 : vector<8x128xf32>
    %101 = arith.mulf %96, %81 : vector<32x128xf32>
    %102 = vector.shape_cast %101 : vector<32x128xf32> to vector<4x8x128xf32>
    %cst_18 = arith.constant dense<0.000000e+00> : vector<8x128xf32>
    %103 = vector.multi_reduction <add>, %102, %cst_18 [0] : vector<4x8x128xf32> to vector<8x128xf32>
    %104 = arith.addf %12, %103 : vector<8x128xf32>
    %105 = vector.shape_cast %81 : vector<32x128xf32> to vector<4x8x128xf32>
    %cst_19 = arith.constant dense<0.000000e+00> : vector<8x128xf32>
    %106 = vector.multi_reduction <add>, %105, %cst_19 [0] : vector<4x8x128xf32> to vector<8x128xf32>
    %107 = arith.addf %12, %106 : vector<8x128xf32>
    %c1_i32 = arith.constant 1 : i32
    %c0_20 = arith.constant 0 : index
    %c0_21 = arith.constant 0 : index
    %c0_22 = arith.constant 0 : index
    %108 = vector.load %arg7[%c0_20, %c0_21, %c0_22] : memref<3x8x128xf32, #tpu.memory_space<vmem>>, vector<1x8x128xf32>
    %109 = vector.shape_cast %108 : vector<1x8x128xf32> to vector<8x128xf32>
    %110 = arith.addf %109, %100 : vector<8x128xf32>
    %c0_23 = arith.constant 0 : index
    %c0_24 = arith.constant 0 : index
    %c0_25 = arith.constant 0 : index
    %111 = vector.load %arg7[%c0_23, %c0_24, %c0_25] : memref<3x8x128xf32, #tpu.memory_space<vmem>>, vector<1x8x128xf32>
    %112 = vector.shape_cast %111 : vector<1x8x128xf32> to vector<8x128xf32>
    %113 = vector.shape_cast %110 : vector<8x128xf32> to vector<1x8x128xf32>
    tpu.vector_store %arg7[%c0_23, %c0_24, %c0_25], %113 {strides = array<i32>} : memref<3x8x128xf32, #tpu.memory_space<vmem>>, vector<1x8x128xf32>,
    %c1_26 = arith.constant 1 : index
    %c0_27 = arith.constant 0 : index
    %c0_28 = arith.constant 0 : index
    %114 = vector.load %arg7[%c1_26, %c0_27, %c0_28] : memref<3x8x128xf32, #tpu.memory_space<vmem>>, vector<1x8x128xf32>
    %115 = vector.shape_cast %114 : vector<1x8x128xf32> to vector<8x128xf32>
    %116 = arith.addf %115, %104 : vector<8x128xf32>
    %c1_29 = arith.constant 1 : index
    %c0_30 = arith.constant 0 : index
    %c0_31 = arith.constant 0 : index
    %117 = vector.load %arg7[%c1_29, %c0_30, %c0_31] : memref<3x8x128xf32, #tpu.memory_space<vmem>>, vector<1x8x128xf32>
    %118 = vector.shape_cast %117 : vector<1x8x128xf32> to vector<8x128xf32>
    %119 = vector.shape_cast %116 : vector<8x128xf32> to vector<1x8x128xf32>
    tpu.vector_store %arg7[%c1_29, %c0_30, %c0_31], %119 {strides = array<i32>} : memref<3x8x128xf32, #tpu.memory_space<vmem>>, vector<1x8x128xf32>,
    %c2_32 = arith.constant 2 : index
    %c0_33 = arith.constant 0 : index
    %c0_34 = arith.constant 0 : index
    %120 = vector.load %arg7[%c2_32, %c0_33, %c0_34] : memref<3x8x128xf32, #tpu.memory_space<vmem>>, vector<1x8x128xf32>
    %121 = vector.shape_cast %120 : vector<1x8x128xf32> to vector<8x128xf32>
    %122 = arith.addf %121, %107 : vector<8x128xf32>
    %c2_35 = arith.constant 2 : index
    %c0_36 = arith.constant 0 : index
    %c0_37 = arith.constant 0 : index
    %123 = vector.load %arg7[%c2_35, %c0_36, %c0_37] : memref<3x8x128xf32, #tpu.memory_space<vmem>>, vector<1x8x128xf32>
    %124 = vector.shape_cast %123 : vector<1x8x128xf32> to vector<8x128xf32>
    %125 = vector.shape_cast %122 : vector<8x128xf32> to vector<1x8x128xf32>
    tpu.vector_store %arg7[%c2_35, %c0_36, %c0_37], %125 {strides = array<i32>} : memref<3x8x128xf32, #tpu.memory_space<vmem>>, vector<1x8x128xf32>,
    %c0_i32_38 = arith.constant 0 : i32
    %126 = arith.cmpi eq, %arg1, %c0_i32_38 : i32
    %127 = arith.extui %126 : i1 to i32
    %c0_i32_39 = arith.constant 0 : i32
    %128 = arith.cmpi ne, %127, %c0_i32_39 : i32
    scf.if %128 {
      %c0_40 = arith.constant 0 : index
      %c0_41 = arith.constant 0 : index
      %c0_42 = arith.constant 0 : index
      %129 = vector.load %arg7[%c0_40, %c0_41, %c0_42] : memref<3x8x128xf32, #tpu.memory_space<vmem>>, vector<3x8x128xf32>
      %c0_43 = arith.constant 0 : index
      %c0_44 = arith.constant 0 : index
      %c0_45 = arith.constant 0 : index
      %130 = vector.load %arg6[%c0_43, %c0_44, %c0_45] : memref<3x8x128xf32, #tpu.memory_space<vmem>>, vector<3x8x128xf32>
      tpu.vector_store %arg6[%c0_43, %c0_44, %c0_45], %129 {strides = array<i32>} : memref<3x8x128xf32, #tpu.memory_space<vmem>>, vector<3x8x128xf32>,
    } else {
    }
    return
  }
  func.func @transform_0(%arg0: i32, %arg1: i32) -> i32 {
    %c0_i32 = arith.constant 0 : i32
    %c0_i32_0 = arith.constant 0 : i32
    return %c0_i32 : i32
  }
  func.func @transform_1(%arg0: i32, %arg1: i32) -> (i32, i32, i32) {
    %c1_i32 = arith.constant 1 : i32
    %0 = arith.muli %arg0, %c1_i32 : i32
    %1 = arith.addi %0, %arg1 : i32
    %c0_i32 = arith.constant 0 : i32
    %c0_i32_0 = arith.constant 0 : i32
    %c0_i32_1 = arith.constant 0 : i32
    return %c0_i32, %1, %c0_i32_0 : i32, i32, i32
  }
  func.func @transform_2(%arg0: i32, %arg1: i32) -> (i32, i32, i32) {
    %c1_i32 = arith.constant 1 : i32
    %0 = arith.muli %arg0, %c1_i32 : i32
    %1 = arith.addi %0, %arg1 : i32
    %c0_i32 = arith.constant 0 : i32
    %c0_i32_0 = arith.constant 0 : i32
    %c0_i32_1 = arith.constant 0 : i32
    return %c0_i32, %1, %c0_i32_0 : i32, i32, i32
  }
  func.func @transform_3(%arg0: i32, %arg1: i32) -> (i32, i32) {
    %c1_i32 = arith.constant 1 : i32
    %0 = arith.muli %arg0, %c1_i32 : i32
    %1 = arith.addi %0, %arg1 : i32
    %c0_i32 = arith.constant 0 : i32
    %c0_i32_0 = arith.constant 0 : i32
    return %1, %c0_i32 : i32, i32
  }
  func.func @transform_4(%arg0: i32, %arg1: i32) -> (i32, i32, i32) {
    %c0_i32 = arith.constant 0 : i32
    %c0_i32_0 = arith.constant 0 : i32
    %c0_i32_1 = arith.constant 0 : i32
    return %arg0, %c0_i32, %c0_i32_0 : i32, i32, i32
  }
}

</mosaic_0001>

<bundles_post_ra>
// kernel: mono_normal_loss.1
= control target key start
LH: loop header
LB: loop body
LE: loop exit
PB: predicated region body
PF: predicated region fallthrough
CT: control target
= control target key end

     0   :  { %9 = vsyncpa [#allocation4], 0  ;;  %s846_s0 = inlined_call_operand.vmem [shape: f32[9], index: 0, kind: input, shape index: {}]   ;;  %s847_s1 = inlined_call_operand.vmem [shape: f32[3,32,128], index: 1, kind: input, shape index: {}]   ;;  %s848_s2 = inlined_call_operand.vmem [shape: f32[3,32,128], index: 2, kind: input, shape index: {}]   ;;  %s849_s3 = inlined_call_operand.vmem [shape: s8[32,128], index: 3, kind: input, shape index: {}]   ;;  %s850_s4 = inlined_call_operand.vmem [shape: f32[3,8,128], index: 4, kind: output, shape index: {}]  }
   0x1   :  { %s16_s17 = sshll.u32 %s846_s0, 4  ;;  %s17_s17 = int_to_ptr.vmem [resolvable:$true] %s16_s17 }
   0x2   :  { %s459_s18 = scalar_lea.vmem %s17_s17, 16  ;;  %p464_p1 = scmp.lt.s32.totalorder %s17_s17, %s17_s17 }
   0x3   :  { %p460_p0 = scmp.ne.s32.totalorder %s17_s17, %s459_s18  ;;  %p465_p2 = scmp.lt.s32.totalorder %s459_s18, %s459_s18 }
   0x5   :  { %p466_p3 = por %p465_p2, %p464_p1 }
   0x7   :  { %p467_p4 = pnand %p466_p3, %p460_p0 }
   0x9   :  { %470 = shalt.err (!%p467_p4)
}
   0xa   :  { %s473_s19 = smov [#allocation3]  }
   0xb   :  { %19 = dma.vmem_to_smem %s17_s17, 16, %s473_s19, [#allocation4]  }
   0xc   :  { %471 = dma.done.wait [#allocation4], 16  }
   0xd   :  { %472 = vsyncadd [#allocation4], 4294967280 }
   0xe   :  { %51 = sfence }
   0xf   :  { %s98_s20 = sld [smem:[#allocation3]]  ;;  %v509_v0 = vld [vmem:[%s847_s1] sm:$0xff]  ;;  %v516_v1 = vld [vmem:[%s847_s1 + $0x8] sm:$0xff]  ;;  %v521_v2 = vld [vmem:[%s847_s1 + $0x10] sm:$0xff] }
  0x10   :  { %s502_s21 = sld [smem:[#allocation3 + $0x1]]  ;;  %v526_v3 = vld [vmem:[%s847_s1 + $0x18] sm:$0xff]  ;;  %v533_v4 = vld [vmem:[%s847_s1 + $0x20] sm:$0xff]  ;;  %v538_v5 = vld [vmem:[%s847_s1 + $0x28] sm:$0xff] }
  0x11   :  { %s504_s22 = sld [smem:[#allocation3 + $0x2]]  ;;  %v543_v6 = vld [vmem:[%s847_s1 + $0x30] sm:$0xff]  ;;  %v548_v7 = vld [vmem:[%s847_s1 + $0x38] sm:$0xff]  ;;  %v553_v8 = vld [vmem:[%s848_s2] sm:$0xff] }
  0x12   :  { %s511_s24 = sld [smem:[#allocation3 + $0x3]]  ;;  %v558_v9 = vld [vmem:[%s848_s2 + $0x8] sm:$0xff]  ;;  %v563_v10 = vld [vmem:[%s848_s2 + $0x10] sm:$0xff]  ;;  %v570_v11 = vld [vmem:[%s848_s2 + $0x18] sm:$0xff]  ;;  %v584_v14 = vmul.f32 %v553_v8, %v553_v8 }
  0x13   :  { %s528_s5 = sld [smem:[#allocation3 + $0x4]]  ;;  %v575_v12 = vld [vmem:[%s848_s2 + $0x20] sm:$0xff]  ;;  %v580_v13 = vld [vmem:[%s848_s2 + $0x28] sm:$0xff]  ;;  %v588_v15 = vmul.f32 %v558_v9, %v558_v9  ;;  %v592_v16 = vmul.f32 %v563_v10, %v563_v10  ;;  %v604_v19 = vld [vmem:[%s848_s2 + $0x30] sm:$0xff]  ;;  %v613_v21 = vmul.f32 %v570_v11, %v570_v11 }
  0x14   :  { %s565_s23 = sld [smem:[#allocation3 + $0x5]]  ;;  %v599_v17 = vld [vmem:[%s847_s1 + $0x40] sm:$0xff]  ;;  %v609_v20 = vld [vmem:[%s848_s2 + $0x38] sm:$0xff]  ;;  %v617_v22 = vmul.f32 %v575_v12, %v575_v12  ;;  %v621_v23 = vmul.f32 %v580_v13, %v580_v13  ;;  %v626_v24 = vld [vmem:[%s847_s1 + $0x48] sm:$0xff]  ;;  %v646_v33 = vmul.f32 %v604_v19, %v604_v19 }
  0x15   :  { %s594_s30 = sld [smem:[#allocation3 + $0x6]]  ;;  %v123_v18 = vstv %s98_s20  ;;  %v631_v25 = vld [vmem:[%s847_s1 + $0x50] sm:$0xff]  ;;  %v636_v26 = vld [vmem:[%s847_s1 + $0x58] sm:$0xff]  ;;  %v650_v34 = vmul.f32 %v609_v20, %v609_v20 }
  0x16   :  { %v124_v27 = vmul.f32 %v123_v18, %v509_v0  ;;  %v125_v28 = vmul.f32 %v123_v18, %v516_v1  ;;  %v126_v29 = vmul.f32 %v123_v18, %v521_v2  ;;  %v127_v30 = vmul.f32 %v123_v18, %v526_v3  ;;  %s660_s1 = sld [smem:[#allocation3 + $0x7]] }
  0x17   :  { %v128_v31 = vstv %s502_s21  ;;  %v137_v32 = vstv %s504_s22  ;;  %s662_s21 = sld [smem:[#allocation3 + $0x8]] }
  0x18   :  { %v129_v35 = vmul.f32 %v533_v4, %v128_v31  ;;  %v130_v36 = vmul.f32 %v538_v5, %v128_v31  ;;  %v131_v37 = vmul.f32 %v543_v6, %v128_v31  ;;  %v132_v38 = vmul.f32 %v548_v7, %v128_v31 }
  0x19   :  { %v138_v39 = vmul.f32 %v599_v17, %v137_v32  ;;  %v139_v40 = vmul.f32 %v626_v24, %v137_v32  ;;  %v140_v41 = vmul.f32 %v631_v25, %v137_v32  ;;  %v141_v42 = vmul.f32 %v636_v26, %v137_v32 }
  0x1a   :  { %v133_v43 = vadd.f32 %v129_v35, %v124_v27  ;;  %v134_v44 = vadd.f32 %v130_v36, %v125_v28  ;;  %v135_v45 = vadd.f32 %v131_v37, %v126_v29  ;;  %v136_v46 = vadd.f32 %v132_v38, %v127_v30 }
  0x1b   :  { %v146_v47 = vstv %s511_s24  ;;  %v151_v48 = vstv %s528_s5  ;;  %v160_v49 = vstv %s565_s23  ;;  %v169_v50 = vstv %s594_s30 }
  0x1c   :  { %v668_v51 = vadd.f32 %v138_v39, %v133_v43  ;;  %v670_v52 = vadd.f32 %v139_v40, %v134_v44  ;;  %v672_v53 = vadd.f32 %v140_v41, %v135_v45  ;;  %v674_v54 = vadd.f32 %v141_v42, %v136_v46 }
  0x1d   :  { %v147_v55 = vmul.f32 %v146_v47, %v509_v0  ;;  %v148_v56 = vmul.f32 %v146_v47, %v516_v1  ;;  %v149_v57 = vmul.f32 %v146_v47, %v521_v2  ;;  %v150_v58 = vmul.f32 %v146_v47, %v526_v3 }
  0x1e   :  { %v152_v59 = vmul.f32 %v533_v4, %v151_v48  ;;  %v153_v60 = vmul.f32 %v538_v5, %v151_v48  ;;  %v154_v61 = vmul.f32 %v543_v6, %v151_v48  ;;  %v155_v62 = vmul.f32 %v548_v7, %v151_v48 }
  0x1f   :  { %v161_v63 = vmul.f32 %v599_v17, %v160_v49  ;;  %v162_v18 = vmul.f32 %v626_v24, %v160_v49  ;;  %v163_v27 = vmul.f32 %v631_v25, %v160_v49  ;;  %v164_v28 = vmul.f32 %v636_v26, %v160_v49 }
  0x20   :  { %v156_v29 = vadd.f32 %v152_v59, %v147_v55  ;;  %v157_v30 = vadd.f32 %v153_v60, %v148_v56  ;;  %v158_v31 = vadd.f32 %v154_v61, %v149_v57  ;;  %v159_v32 = vadd.f32 %v155_v62, %v150_v58 }
  0x21   :  { %v170_v35 = vmul.f32 %v169_v50, %v509_v0  ;;  %v171_v36 = vmul.f32 %v169_v50, %v516_v1  ;;  %v172_v37 = vmul.f32 %v169_v50, %v521_v2  ;;  %v173_v38 = vmul.f32 %v169_v50, %v526_v3 }
  0x22   :  { %v692_v39 = vadd.f32 %v161_v63, %v156_v29  ;;  %v694_v40 = vadd.f32 %v162_v18, %v157_v30  ;;  %v696_v41 = vadd.f32 %v163_v27, %v158_v31  ;;  %v698_v42 = vadd.f32 %v164_v28, %v159_v32  ;;  %v745_v29 = vld [vmem:[%s848_s2 + $0x40] sm:$0xff]  ;;  %v750_v30 = vld [vmem:[%s848_s2 + $0x48] sm:$0xff] }
  0x23   :  { %v174_v43 = vstv %s660_s1  ;;  %v183_v44 = vstv %s662_s21  ;;  %v192_v45 = vmul.f32 %v668_v51, %v668_v51  ;;  %v193_v0 = vmul.f32 %v670_v52, %v670_v52 }
  0x24   :  { %v175_v1 = vmul.f32 %v533_v4, %v174_v43  ;;  %v176_v2 = vmul.f32 %v538_v5, %v174_v43  ;;  %v177_v3 = vmul.f32 %v543_v6, %v174_v43  ;;  %v178_v46 = vmul.f32 %v548_v7, %v174_v43 }
  0x25   :  { %v184_v47 = vmul.f32 %v599_v17, %v183_v44  ;;  %v185_v48 = vmul.f32 %v626_v24, %v183_v44  ;;  %v186_v49 = vmul.f32 %v631_v25, %v183_v44  ;;  %v187_v50 = vmul.f32 %v636_v26, %v183_v44 }
  0x26   :  { %v179_v55 = vadd.f32 %v175_v1, %v170_v35  ;;  %v180_v56 = vadd.f32 %v176_v2, %v171_v36  ;;  %v181_v57 = vadd.f32 %v177_v3, %v172_v37  ;;  %v182_v58 = vadd.f32 %v178_v46, %v173_v38  ;;  %v755_v35 = vld [vmem:[%s848_s2 + $0x50] sm:$0xff]  ;;  %v760_v36 = vld [vmem:[%s848_s2 + $0x58] sm:$0xff] }
  0x27   :  { %v194_v4 = vmul.f32 %v672_v53, %v672_v53  ;;  %v195_v5 = vmul.f32 %v674_v54, %v674_v54  ;;  %v196_v6 = vmul.f32 %v692_v39, %v692_v39  ;;  %v197_v7 = vmul.f32 %v694_v40, %v694_v40 }
  0x28   :  { %v722_v17 = vadd.f32 %v184_v47, %v179_v55  ;;  %v724_v24 = vadd.f32 %v185_v48, %v180_v56  ;;  %v726_v25 = vadd.f32 %v186_v49, %v181_v57  ;;  %v728_v26 = vadd.f32 %v187_v50, %v182_v58 }
  0x29   :  { %v198_v59 = vmul.f32 %v696_v41, %v696_v41  ;;  %v199_v60 = vmul.f32 %v698_v42, %v698_v42  ;;  %v200_v61 = vadd.f32 %v196_v6, %v192_v45  ;;  %v201_v62 = vadd.f32 %v197_v7, %v193_v0 }
  0x2a   :  { %v204_v63 = vmul.f32 %v722_v17, %v722_v17  ;;  %v205_v18 = vmul.f32 %v724_v24, %v724_v24  ;;  %v206_v27 = vmul.f32 %v726_v25, %v726_v25  ;;  %v207_v28 = vmul.f32 %v728_v26, %v728_v26 }
  0x2b   :  { %v202_v31 = vadd.f32 %v198_v59, %v194_v4  ;;  %v203_v32 = vadd.f32 %v199_v60, %v195_v5  ;;  %v254_v37 = vadd.f32 %v617_v22, %v584_v14  ;;  %v255_v38 = vadd.f32 %v621_v23, %v588_v15  ;;  %v286_v14 = vld [vmem:[%s849_s3] sm:$0xff] }
  0x2c   :  { %v208_v43 = vadd.f32 %v204_v63, %v200_v61  ;;  %v209_v44 = vadd.f32 %v205_v18, %v201_v62  ;;  %v256_v45 = vadd.f32 %v646_v33, %v592_v16  ;;  %v257_v0 = vadd.f32 %v650_v34, %v613_v21 }
  0x2d   :  { %v210_v1 = vadd.f32 %v206_v27, %v202_v31  ;;  %v211_v2 = vadd.f32 %v207_v28, %v203_v32  ;;  %v258_v3 = vmul.f32 %v745_v29, %v745_v29  ;;  %v259_v46 = vmul.f32 %v750_v30, %v750_v30 }
  0x2e   :  { %v212_v15 = vmax.f32 %v208_v43, 1e-24  ;;  %v213_v22 = vmax.f32 %v209_v44, 1e-24  ;;  %v260_v16 = vmul.f32 %v755_v35, %v755_v35  ;;  %v261_v21 = vmul.f32 %v760_v36, %v760_v36 }
  0x2f   :  { %v214_v23 = vmax.f32 %v210_v1, 1e-24  ;;  %v215_v33 = vmax.f32 %v211_v2, 1e-24  ;;  %v262_v34 = vadd.f32 %v258_v3, %v254_v37  ;;  %v263_v47 = vadd.f32 %v259_v46, %v255_v38 }
  0x30   :  { %443 = vrsqrt.f32 %v212_v15  ;;  %v264_v48 = vadd.f32 %v260_v16, %v256_v45  ;;  %v265_v49 = vadd.f32 %v261_v21, %v257_v0  ;;  %v287_v50 = vunpack.c.0.s8 %v286_v14 }
  0x31   :  { %445 = vrsqrt.f32 %v213_v22  ;;  %v266_v55 = vmax.f32 %v262_v34, 1e-24  ;;  %v267_v56 = vmax.f32 %v263_v47, 1e-24  ;;  %v288_v57 = vunpack.c.1.s8 %v286_v14 }
  0x32   :  { %447 = vrsqrt.f32 %v214_v23  ;;  %v268_v58 = vmax.f32 %v264_v48, 1e-24  ;;  %v269_v4 = vmax.f32 %v265_v49, 1e-24  ;;  %v289_v5 = vunpack.c.2.s8 %v286_v14 }
  0x33   :  { %449 = vrsqrt.f32 %v215_v33  ;;  %v290_v6 = vunpack.c.3.s8 %v286_v14  ;;  %v781_v7 = vcvt.s32.f32 %v287_v50  ;;  %v783_v59 = vcvt.s32.f32 %v288_v57 }
  0x34   :  { %451 = vrsqrt.f32 %v266_v55  ;;  %v785_v60 = vcvt.s32.f32 %v289_v5 }
  0x35   :  { %453 = vrsqrt.f32 %v267_v56  ;;  %v367_v61 = vadd.f32 %v783_v59, %v781_v7  ;;  %v789_v62 = vcvt.s32.f32 %v290_v6 }
  0x36   :  { %455 = vrsqrt.f32 %v268_v58 }
  0x37   :  { %457 = vrsqrt.f32 %v269_v4  ;;  %v368_v63 = vadd.f32 %v367_v61, %v785_v60 }
  0x39   :  { %v369_v18 = vadd.f32 %v368_v63, %v789_v62 }
  0x3b   :  { %390 = vst [vmem:[%s850_s4 + $0x10] sm:$0xff] %v369_v18 }
  0x3d   :  { %v444_v27 = vpop.eup %443 }
  0x3e   :  { %v446_v28 = vpop.eup %445  ;;  %v220_v32 = vmul.f32 %v444_v27, %v668_v51  ;;  %v798_v37 = vmul.f32 %v444_v27, %v692_v39  ;;  %v803_v45 = vmul.f32 %v444_v27, %v722_v17 }
  0x3f   :  { %v448_v31 = vpop.eup %447  ;;  %v221_v43 = vmul.f32 %v446_v28, %v670_v52  ;;  %v225_v44 = vmul.f32 %v446_v28, %v694_v40  ;;  %v806_v0 = vmul.f32 %v446_v28, %v724_v24 }
  0x40   :  { %v450_v38 = vpop.eup %449  ;;  %v222_v2 = vmul.f32 %v448_v31, %v672_v53  ;;  %v226_v51 = vmul.f32 %v448_v31, %v696_v41  ;;  %v230_v39 = vmul.f32 %v448_v31, %v726_v25 }
  0x41   :  { %v452_v1 = vpop.eup %451  ;;  %v223_v3 = vmul.f32 %v450_v38, %v674_v54  ;;  %v227_v52 = vmul.f32 %v450_v38, %v698_v42  ;;  %v231_v40 = vmul.f32 %v450_v38, %v728_v26 }
  0x42   :  { %v454_v46 = vpop.eup %453  ;;  %v274_v17 = vmul.f32 %v452_v1, %v553_v8  ;;  %v278_v14 = vmul.f32 %v452_v1, %v575_v12  ;;  %v282_v54 = vmul.f32 %v452_v1, %v745_v29 }
  0x43   :  { %v456_v24 = vpop.eup %455  ;;  %v275_v15 = vmul.f32 %v454_v46, %v558_v9  ;;  %v279_v53 = vmul.f32 %v454_v46, %v580_v13  ;;  %v283_v41 = vmul.f32 %v454_v46, %v750_v30 }
  0x44   :  { %v458_v22 = vpop.eup %457  ;;  %v276_v25 = vmul.f32 %v456_v24, %v563_v10  ;;  %v280_v42 = vmul.f32 %v456_v24, %v604_v19  ;;  %v284_v26 = vmul.f32 %v456_v24, %v755_v35  ;;  %v295_v16 = vsub.f32 %v220_v32, %v274_v17 }
  0x45   :  { %v277_v8 = vmul.f32 %v458_v22, %v570_v11  ;;  %v281_v12 = vmul.f32 %v458_v22, %v609_v20  ;;  %v285_v9 = vmul.f32 %v458_v22, %v760_v36  ;;  %v296_v21 = vsub.f32 %v221_v43, %v275_v15 }
  0x46   :  { %v297_v13 = vsub.f32 %v222_v2, %v276_v25  ;;  %v299_v23 = vand.u32 2147483647, %v295_v16  ;;  %v303_v29 = vsub.f32 %v798_v37, %v278_v14  ;;  %v304_v30 = vsub.f32 %v225_v44, %v279_v53 }
  0x47   :  { %v298_v33 = vsub.f32 %v223_v3, %v277_v8  ;;  %v300_v34 = vand.u32 2147483647, %v296_v21  ;;  %v305_v10 = vsub.f32 %v226_v51, %v280_v42  ;;  %v306_v47 = vsub.f32 %v227_v52, %v281_v12 }
  0x48   :  { %v301_v19 = vand.u32 2147483647, %v297_v13  ;;  %v307_v48 = vand.u32 2147483647, %v303_v29  ;;  %v308_v35 = vand.u32 2147483647, %v304_v30  ;;  %v315_v49 = vsub.f32 %v803_v45, %v282_v54 }
  0x49   :  { %v302_v11 = vand.u32 2147483647, %v298_v33  ;;  %v309_v50 = vand.u32 2147483647, %v305_v10  ;;  %v310_v20 = vand.u32 2147483647, %v306_v47  ;;  %v316_v36 = vsub.f32 %v806_v0, %v283_v41 }
  0x4a   :  { %v311_v55 = vadd.f32 %v307_v48, %v299_v23  ;;  %v312_v56 = vadd.f32 %v308_v35, %v300_v34  ;;  %v317_v57 = vsub.f32 %v230_v39, %v284_v26  ;;  %v318_v58 = vsub.f32 %v231_v40, %v285_v9 }
  0x4b   :  { %v313_v4 = vadd.f32 %v309_v50, %v301_v19  ;;  %v314_v5 = vadd.f32 %v310_v20, %v302_v11  ;;  %v319_v6 = vand.u32 2147483647, %v315_v49  ;;  %v320_v61 = vand.u32 2147483647, %v316_v36 }
  0x4c   :  { %v321_v63 = vand.u32 2147483647, %v317_v57  ;;  %v322_v18 = vand.u32 2147483647, %v318_v58  ;;  %v327_v27 = vmul.f32 %v274_v17, %v220_v32  ;;  %v328_v28 = vmul.f32 %v275_v15, %v221_v43 }
  0x4d   :  { %v323_v31 = vadd.f32 %v319_v6, %v311_v55  ;;  %v324_v38 = vadd.f32 %v320_v61, %v312_v56  ;;  %v329_v1 = vmul.f32 %v276_v25, %v222_v2  ;;  %v330_v46 = vmul.f32 %v277_v8, %v223_v3 }
  0x4e   :  { %v325_v24 = vadd.f32 %v321_v63, %v313_v4  ;;  %v326_v22 = vadd.f32 %v322_v18, %v314_v5  ;;  %v331_v16 = vmul.f32 %v278_v14, %v798_v37  ;;  %v332_v21 = vmul.f32 %v279_v53, %v225_v44 }
  0x4f   :  { %v333_v13 = vmul.f32 %v280_v42, %v226_v51  ;;  %v334_v23 = vmul.f32 %v281_v12, %v227_v52  ;;  %v339_v29 = vmul.f32 %v282_v54, %v803_v45  ;;  %v340_v30 = vmul.f32 %v283_v41, %v806_v0 }
  0x50   :  { %v335_v33 = vadd.f32 %v331_v16, %v327_v27  ;;  %v336_v34 = vadd.f32 %v332_v21, %v328_v28  ;;  %v341_v10 = vmul.f32 %v284_v26, %v230_v39  ;;  %v342_v32 = vmul.f32 %v285_v9, %v231_v40 }
  0x51   :  { %v337_v43 = vadd.f32 %v333_v13, %v329_v1  ;;  %v338_v17 = vadd.f32 %v334_v23, %v330_v46  ;;  %v351_v2 = vmul.f32 %v323_v31, %v781_v7  ;;  %v352_v3 = vmul.f32 %v324_v38, %v783_v59 }
  0x52   :  { %v343_v15 = vadd.f32 %v339_v29, %v335_v33  ;;  %v344_v25 = vadd.f32 %v340_v30, %v336_v34  ;;  %v353_v37 = vmul.f32 %v325_v24, %v785_v60  ;;  %v354_v45 = vmul.f32 %v326_v22, %v789_v62 }
  0x53   :  { %v345_v44 = vadd.f32 %v341_v10, %v337_v43  ;;  %v346_v51 = vadd.f32 %v342_v32, %v338_v17  ;;  %v355_v52 = vadd.f32 %v352_v3, %v351_v2 }
  0x54   :  { %v347_v0 = vsub.f32 1.0, %v343_v15  ;;  %v348_v14 = vsub.f32 1.0, %v344_v25 }
  0x55   :  { %v349_v53 = vsub.f32 1.0, %v345_v44  ;;  %v350_v39 = vsub.f32 1.0, %v346_v51  ;;  %v356_v40 = vadd.f32 %v355_v52, %v353_v37 }
  0x56   :  { %v359_v54 = vmul.f32 %v347_v0, %v781_v7  ;;  %v360_v41 = vmul.f32 %v348_v14, %v783_v59 }
  0x57   :  { %v357_v42 = vadd.f32 %v356_v40, %v354_v45  ;;  %v361_v26 = vmul.f32 %v349_v53, %v785_v60  ;;  %v362_v8 = vmul.f32 %v350_v39, %v789_v62 }
  0x58   :  { %v363_v12 = vadd.f32 %v360_v41, %v359_v54 }
  0x59   :  { %388 = vst [vmem:[%s850_s4] sm:$0xff] %v357_v42 }
  0x5a   :  { %v364_v9 = vadd.f32 %v363_v12, %v361_v26 }
  0x5c   :  { %v365_v47 = vadd.f32 %v364_v9, %v362_v8 }
  0x5e   :  { %389 = vst [vmem:[%s850_s4 + $0x8] sm:$0xff] %v365_v47 }
  0x5f   :  { %395 = vsyncpa [#allocation4], 1 }

</bundles_post_ra>
